<compile_context>
chip_gen: v5e
topology: v5e:2x2
jax: 0.10.0
libtpu: 0.0.40
codegen_flags: <defaults>
</compile_context>

<pallas_src>
import numpy as np

import jax
import jax.numpy as jnp
from jax.experimental import pallas as pl
from jax.experimental.pallas import tpu as pltpu


# ----------------------------- kernel ----------------------------------------


def _linear_kernel(x_ref, w_ref, b_ref, o_ref):
    """Fused linear on one row tile: (tile_m, D) @ (D, Npad) + (1, Npad)."""
    y = jnp.dot(x_ref[...], w_ref[...], preferred_element_type=jnp.float32)
    o_ref[...] = (y + b_ref[...]).astype(o_ref.dtype)


# ----------------------------- tiling helpers --------------------------------

# Conservative budget so the same tiling compiles on v7x (64 MiB physical VMEM)
# as well as v5e/v6e (128 MiB).
_VMEM_BUDGET_BYTES = 40 * 1024 * 1024
_VMEM_LIMIT_BYTES = 48 * 1024 * 1024


def _round_up(v: int, m: int) -> int:
    return -(-v // m) * m


def _choose_row_tile(m_pad8: int, d: int, n_pad: int) -> int:
    """Pick a row tile from a VMEM budget (f32 everywhere).

    Budget = 2x-buffered x tile + 2x-buffered out tile + single-buffered
    weights/bias (Buffered(1)).  Prefers >= 2 grid steps when there is enough
    work so v7x's second TensorCore gets a share of the 'parallel' axis.
    """
    fixed = (d * n_pad + n_pad) * 4            # W + bias, single buffered
    per_row = 2 * (d + n_pad) * 4              # x tile + out tile, double buffered
    cap = max(8, (_VMEM_BUDGET_BYTES - fixed) // per_row)
    cap = (cap // 8) * 8                       # sublane-aligned
    tile = min(1024, cap)                      # >1024 rows buys ~nothing (mem-bound)
    if m_pad8 <= tile:
        if m_pad8 >= 16:
            # Everything fits in one tile: split in two for v7x dual-TC.
            tile = _round_up(m_pad8 // 2, 8)
        else:
            tile = m_pad8
    return tile


# ----------------------------- pallas wrapper --------------------------------


def _linear_pallas(x2, w, b2):
    """y = x2 @ w + b2 via one pallas_call, row-tiled over M.

    Expects w: (D, Npad) and b2: (1, Npad) with Npad a multiple of 128
    (lane-dense output).  Rows of x2 are zero-padded to a tile multiple and
    the padding is sliced off again before returning.
    """
    M, D = x2.shape
    Dw, N = w.shape
    assert D == Dw and N % 128 == 0

    tile_m = _choose_row_tile(_round_up(M, 8), D, N)
    m_pad = _round_up(M, tile_m)
    if m_pad != M:
        x2 = jnp.pad(x2, ((0, m_pad - M), (0, 0)))
    grid_m = m_pad // tile_m

    flops = 2 * m_pad * D * N
    bytes_accessed = 4 * (m_pad * D + D * N + N + m_pad * N)

    out = pl.pallas_call(
        _linear_kernel,
        out_shape=jax.ShapeDtypeStruct((m_pad, N), x2.dtype),
        grid_spec=pltpu.PrefetchScalarGridSpec(
            num_scalar_prefetch=0,
            grid=(grid_m,),
            in_specs=[
                pl.BlockSpec((tile_m, D), lambda m: (m, 0)),
                # Grid-invariant blocks: no point double-buffering them.
                pl.BlockSpec((D, N), lambda m: (0, 0),
                             pipeline_mode=pl.Buffered(1)),
                pl.BlockSpec((1, N), lambda m: (0, 0),
                             pipeline_mode=pl.Buffered(1)),
            ],
            out_specs=pl.BlockSpec((tile_m, N), lambda m: (m, 0)),
        ),
        compiler_params=pltpu.CompilerParams(
            dimension_semantics=("parallel",),
            vmem_limit_bytes=_VMEM_LIMIT_BYTES,
        ),
        cost_estimate=pl.CostEstimate(
            flops=flops, transcendentals=0, bytes_accessed=bytes_accessed),
    )(x2, w, b2)

    return out[:M] if m_pad != M else out


# ----------------------------- weight packing (hoisted) ----------------------


def _pack_fused(Wf, bf):
    """Zero-pad the output (lane) dim up to a multiple of 128."""
    D, N = Wf.shape
    n_pad = pl.cdiv(N, 128) * 128
    Wp = jnp.pad(Wf, ((0, 0), (0, n_pad - N)))
    bp = jnp.pad(bf, ((0, 0), (0, n_pad - N)))
    return Wp, bp, N


def make_continuous_model_nonshared(W, b):
    """share_readout=False.  W: (n_slots, D, G), b: (n_slots, G).

    Returns a jitted forward: x (bs, ns, D) -> y (bs, n_slots, ns, G) with
    y[b, i, j] = x[b, j] @ W[i] + b[i]  (matches the PyTorch stacking order).
    """
    n_slots, D, G = W.shape
    # Fuse all readouts: column (i*G + g) of Wf is W[i][:, g].
    Wf = jnp.transpose(W, (1, 0, 2)).reshape(D, n_slots * G)
    bf = b.reshape(1, n_slots * G)
    Wp, bp, n_real = _pack_fused(Wf, bf)

    @jax.jit
    def forward(x):
        bs, ns, d = x.shape
        if ns != n_slots:
            raise ValueError("Invalid number of slots.")
        y2 = _linear_pallas(x.reshape(bs * ns, d), Wp, bp)[:, :n_real]
        y = y2.reshape(bs, ns, n_slots, G)          # (bs, j, i, G)
        return jnp.transpose(y, (0, 2, 1, 3))       # (bs, i, j, G)

    return forward


def make_continuous_model_shared(W, b):
    """share_readout=True.  W: (D, G), b: (G,).

    Returns a jitted forward: x (bs, ns, D) -> y (bs, ns, G).
    """
    D, G = W.shape
    Wp, bp, n_real = _pack_fused(W, b.reshape(1, G))

    @jax.jit
    def forward(x):
        bs, ns, d = x.shape
        y2 = _linear_pallas(x.reshape(bs * ns, d), Wp, bp)[:, :n_real]
        return y2.reshape(bs, ns, G)

    return forward


# ----------------------------- main -------------------------------------------

if __name__ == "__main__":
    bs = 2          # batch
    n_slots = 4     # number of slots
    pred_dim = 32   # pred_slot_dimensionality
    gt_dim = 3      # gt_slot_dimensionality

    key = jax.random.PRNGKey(0)
    kx, kw, kb, kws, kbs, kx2 = jax.random.split(key, 6)

    x = jax.random.normal(kx, (bs, n_slots, pred_dim), dtype=jnp.float32)
    W_stack = 0.1 * jax.random.normal(kw, (n_slots, pred_dim, gt_dim), jnp.float32)
    b_stack = 0.1 * jax.random.normal(kb, (n_slots, gt_dim), jnp.float32)
    W_shared = 0.1 * jax.random.normal(kws, (pred_dim, gt_dim), jnp.float32)
    b_shared = 0.1 * jax.random.normal(kbs, (gt_dim,), jnp.float32)

    # Weight packing hoisted out of the hot path (one-time).
    nonshared_fwd = make_continuous_model_nonshared(W_stack, b_stack)
    shared_fwd = make_continuous_model_shared(W_shared, b_shared)

    # --- share_readout = False -------------------------------------------
    y_ns = jax.block_until_ready(nonshared_fwd(x))
    y_ns_ref = (
        jnp.einsum("bjd,idg->bijg", x, W_stack) + b_stack[None, :, None, :]
    )
    assert y_ns.shape == (bs, n_slots, n_slots, gt_dim)
    np.testing.assert_allclose(np.asarray(y_ns), np.asarray(y_ns_ref),
                               rtol=1e-5, atol=1e-5)

    # --- share_readout = True --------------------------------------------
    y_s = jax.block_until_ready(shared_fwd(x))
    y_s_ref = jnp.einsum("bjd,dg->bjg", x, W_shared) + b_shared
    assert y_s.shape == (bs, n_slots, gt_dim)
    np.testing.assert_allclose(np.asarray(y_s), np.asarray(y_s_ref),
                               rtol=1e-5, atol=1e-5)

    # --- non-multiple-of-tile batch: exercises row padding + a 2-step
    #     "parallel" grid (v7x dual-TC path) ------------------------------
    bs2 = 5
    x_big = jax.random.normal(kx2, (bs2, n_slots, pred_dim), jnp.float32)
    y_big = jax.block_until_ready(nonshared_fwd(x_big))
    y_big_ref = (
        jnp.einsum("bjd,idg->bijg", x_big, W_stack) + b_stack[None, :, None, :]
    )
    np.testing.assert_allclose(np.asarray(y_big), np.asarray(y_big_ref),
                               rtol=1e-5, atol=1e-5)

    print("KERNEL_OK")
</pallas_src>

<mosaic_0001>
module attributes {stable_mosaic.version = 11 : i64} {
  func.func @_linear_kernel(%arg0: i32, %arg1: memref<8x32xf32, #tpu.memory_space<vmem>>, %arg2: memref<32x128xf32, #tpu.memory_space<vmem>>, %arg3: memref<1x128xf32, #tpu.memory_space<vmem>>, %arg4: memref<8x128xf32, #tpu.memory_space<vmem>>) attributes {dimension_semantics = [#tpu.dimension_semantics<parallel>], iteration_bounds = array<i64: 1>, scalar_prefetch = 0 : i64, scratch_operands = 0 : i64, tpu.core_type = #tpu.core_type<tc>, window_params = [{transform_indices = @transform_0, window_bounds = array<i64: 8, 32>}, {pipeline_mode = #tpu.pipeline_mode<synchronous>, transform_indices = @transform_1, window_bounds = array<i64: 32, 128>}, {pipeline_mode = #tpu.pipeline_mode<synchronous>, transform_indices = @transform_2, window_bounds = array<i64: 1, 128>}, {transform_indices = @transform_3, window_bounds = array<i64: 8, 128>}]} {
    %c0 = arith.constant 0 : index
    %c0_0 = arith.constant 0 : index
    %0 = vector.load %arg1[%c0, %c0_0] : memref<8x32xf32, #tpu.memory_space<vmem>>, vector<8x32xf32>
    %c0_1 = arith.constant 0 : index
    %c0_2 = arith.constant 0 : index
    %1 = vector.load %arg2[%c0_1, %c0_2] : memref<32x128xf32, #tpu.memory_space<vmem>>, vector<32x128xf32>
    %cst = arith.constant dense<0.000000e+00> : vector<8x128xf32>
    %2 = tpu.matmul %0, %1, %cst {dimension_numbers = #tpu.dot_dimension_numbers<[1], [0], [0], [1], [0, 0, 1, 1], [], []>} : vector<8x32xf32>, vector<32x128xf32>, vector<8x128xf32> -> vector<8x128xf32>
    %c0_3 = arith.constant 0 : index
    %c0_4 = arith.constant 0 : index
    %3 = vector.load %arg3[%c0_3, %c0_4] : memref<1x128xf32, #tpu.memory_space<vmem>>, vector<1x128xf32>
    %4 = vector.broadcast %3 : vector<1x128xf32> to vector<8x128xf32>
    %5 = arith.addf %2, %4 : vector<8x128xf32>
    %c0_5 = arith.constant 0 : index
    %c0_6 = arith.constant 0 : index
    %6 = vector.load %arg4[%c0_5, %c0_6] : memref<8x128xf32, #tpu.memory_space<vmem>>, vector<8x128xf32>
    tpu.vector_store %arg4[%c0_5, %c0_6], %5 {strides = array<i32>} : memref<8x128xf32, #tpu.memory_space<vmem>>, vector<8x128xf32>,
    return
  }
  func.func @transform_0(%arg0: i32) -> (i32, i32) {
    %c0_i32 = arith.constant 0 : i32
    %c0_i32_0 = arith.constant 0 : i32
    return %arg0, %c0_i32 : i32, i32
  }
  func.func @transform_1(%arg0: i32) -> (i32, i32) {
    %c0_i32 = arith.constant 0 : i32
    %c0_i32_0 = arith.constant 0 : i32
    %c0_i32_1 = arith.constant 0 : i32
    return %c0_i32, %c0_i32_0 : i32, i32
  }
  func.func @transform_2(%arg0: i32) -> (i32, i32) {
    %c0_i32 = arith.constant 0 : i32
    %c0_i32_0 = arith.constant 0 : i32
    %c0_i32_1 = arith.constant 0 : i32
    return %c0_i32, %c0_i32_0 : i32, i32
  }
  func.func @transform_3(%arg0: i32) -> (i32, i32) {
    %c0_i32 = arith.constant 0 : i32
    %c0_i32_0 = arith.constant 0 : i32
    return %arg0, %c0_i32 : i32, i32
  }
}

</mosaic_0001>

<bundles_post_ra>
// kernel: forward.1
= control target key start
LH: loop header
LB: loop body
LE: loop exit
PB: predicated region body
PF: predicated region fallthrough
CT: control target
= control target key end

     0   :  { %8 = vsyncpa [#allocation3], 0  ;;  %s178_s0 = inlined_call_operand.hbm [shape: f32[8,32], index: 0, kind: input, shape index: {}]   ;;  %s179_s1 = inlined_call_operand.hbm [shape: f32[32,128], index: 1, kind: input, shape index: {}]   ;;  %s180_s2 = inlined_call_operand.vmem [shape: f32[1,128], index: 2, kind: input, shape index: {}]   ;;  %s181_s3 = inlined_call_operand.vmem [shape: f32[8,128], index: 3, kind: output, shape index: {}]  }
   0x1   :  { %s15_s14 = sshll.u32 %s178_s0, 4  ;;  %s16_s14 = int_to_ptr.hbm [resolvable:$true] %s15_s14 }
   0x2   :  { %9 = vsyncpa [#allocation5], 0  ;;  %s142_s15 = smov [#allocation2]   ;;  %s25_s19 = sshll.u32 %s179_s1, 4  ;;  %s26_s19 = int_to_ptr.hbm [resolvable:$true] %s25_s19 }
   0x3   :  { %s17_s16 = sshll.u32 %s142_s15, 4  ;;  %s143_s20 = smov [#allocation4]   ;;  %s18_s16 = int_to_ptr.vmem [resolvable:$true] %s17_s16 }
   0x4   :  { %20 = dma.hbm_to_vmem [thread:$0]  %s16_s14, 128, %s18_s16, [#allocation3]  }
   0x5   :  { %s27_s21 = sshll.u32 %s143_s20, 4  ;;  %s144_s22 = smov 128   ;;  %s28_s21 = int_to_ptr.vmem [resolvable:$true] %s27_s21 }
   0x6   :  { %s145_s23 = smov 8  }
   0x7   :  { %33 = dma.hbm_to_vmem [thread:$0]  %s26_s19, 512, %s28_s21, [#allocation5], %s144_s22, %s144_s22, %s145_s23  }
   0x8   :  { %138 = dma.done.wait [#allocation3], 128  }
   0x9   :  { %139 = vsyncadd [#allocation3], 4294967168 }
   0xa   :  { %140 = dma.done.wait [#allocation5], 512  }
   0xb   :  { %141 = vsyncadd [#allocation5], 4294966784  ;;  %v48_v0 = vld [vmem:[#allocation4 + $0x18] sm:$0xff]  ;;  %v47_v1 = vld [vmem:[#allocation4 + $0x10] sm:$0xff]  ;;  %vm53_vm0 = vcmask 261120  }
   0xc   :  { %69 = vmatpush.msra.mxu0 %v48_v0  ;;  %v46_v2 = vld [vmem:[#allocation4 + $0x8] sm:$0xff]  ;;  %v45_v3 = vld [vmem:[#allocation4] sm:$0xff]  ;;  %v44_v4 = vld [vmem:[#allocation2] sm:$0xff] }
   0xd   :  { %v89_v5 = vld [vmem:[%s180_s2] ss:$0 sm:$0xff] }
   0xe   :  { %70 = vmatpush.msra.mxu0 %v47_v1 }
  0x10   :  { %71 = vmatpush.msra.mxu0 %v46_v2 }
  0x12   :  { %72 = vmatpush.msra.mxu0 %v45_v3 }
  0x13   :  { %84 = vmatmul.msk.f32.vlgmr.msra.gmra.mxu0 %vm53_vm0, %v44_v4 }
  0x90   :  { %v74_v6 = vpop.f32.mrf.mxu0 }
  0x91   :  { %v75_v7 = vadd.f32 %v89_v5, %v74_v6 }
  0x93   :  { %77 = vst [vmem:[%s181_s3] sm:$0xff] %v75_v7 }
  0x94   :  { %82 = vsyncpa [#allocation3], 1 }
  0x95   :  { %83 = vsyncpa [#allocation5], 1 }

</bundles_post_ra>
